<compile_context>
chip_gen: v7x
topology: tpu7x:2x2x1
jax: 0.10.0
libtpu: 0.0.40
codegen_flags: <defaults>
</compile_context>

<pallas_src>
import functools

import jax
import jax.numpy as jnp
from jax.experimental import pallas as pl
from jax.experimental.pallas import tpu as pltpu


def _cheb_kernel(x_ref, lap_ref, w_ref, b_ref, o_ref, slab_ref, *, K, width):
    """One batch chunk: Chebyshev recursion + single fused weight matmul.

    x_ref:    (N, width)           width = TB*Cin, compute dtype (bf16)
    lap_ref:  (N, N)               dense normalized Laplacian, compute dtype
    w_ref:    (K*width, TB*Cout)   block-diagonal fused weight, compute dtype
    b_ref:    (1, TB*Cout)         bias tiled per batch element, f32
    o_ref:    (N, TB*Cout)         output chunk
    slab_ref: (N, K*width)         VMEM scratch holding T_0 .. T_{K-1} (bf16)
    """
    cdt = lap_ref.dtype
    L = lap_ref[...]                                     # (N, N), bf16 on MXU

    # T_0 = X.  All Chebyshev states live only in the bf16 slab; the MXU sees
    # bf16 operands with an f32 accumulator (preferred_element_type), and no
    # f32 (N, width) carries are kept live.
    slab_ref[:, 0:width] = x_ref[...].astype(cdt)

    if K > 1:
        t1 = jnp.dot(L, slab_ref[:, 0:width],
                     preferred_element_type=jnp.float32)
        slab_ref[:, width:2 * width] = t1.astype(cdt)

    for k in range(2, K):
        t_prev = slab_ref[:, (k - 1) * width:k * width]          # T_{k-1}, bf16
        t_prev2 = slab_ref[:, (k - 2) * width:(k - 1) * width]   # T_{k-2}, bf16
        t2 = (2.0 * jnp.dot(L, t_prev, preferred_element_type=jnp.float32)
              - t_prev2.astype(jnp.float32))
        slab_ref[:, k * width:(k + 1) * width] = t2.astype(cdt)

    # One fused MXU matmul over the (K, Cin) contraction for all TB packed
    # batch elements at once -> lane-dense (N, TB*Cout) output.
    out = jnp.dot(slab_ref[...], w_ref[...], preferred_element_type=jnp.float32)
    out = out + b_ref[...].astype(jnp.float32)           # broadcast over rows
    o_ref[...] = out.astype(o_ref.dtype)


def _pick_batch_block(B, Cin, Cout, K, w_cap_bytes=8 << 20):
    """Pick TB | B for the per-step batch chunk.

    Target lane widths (largest first) fill the MXU on every generation:
    512 covers v5e's 4x128 arrays, 256 the 2x256 arrays of v6e/v7x, 128 is
    the floor for unmasked stores.  Prefer >=2 grid steps (v7x megacore) and
    cap the TB^2-scaling fused weight.  If channel counts are too small to
    hit any target, process the whole batch in one step (blocks == full
    array dims, which also satisfies the (8,128) rule).
    """
    def w_bytes(tb):
        return K * tb * Cin * tb * Cout * 2  # bf16 fused weight

    candidates = [tb for tb in range(1, B + 1) if B % tb == 0]
    for target in (512, 256, 128):
        for need_multi_step in (True, False):
            for tb in candidates:
                if (tb * Cin) % target != 0 or (tb * Cout) % 128 != 0:
                    continue
                if w_bytes(tb) > w_cap_bytes:
                    continue
                if need_multi_step and (B // tb) < 2:
                    continue
                return tb
    # Sub-128 widths: full-extent blocks are the only guaranteed-legal choice.
    return B


def _vmem_limit_bytes():
    """Scoped-VMEM request with headroom for compiler-internal scratch."""
    try:
        cap = pltpu.get_tpu_info().vmem_capacity_bytes
        return int(max(32 << 20, min(cap - (16 << 20), 100 << 20)))
    except Exception:
        return 48 << 20  # conservative: fits v7x (64 MiB physical) with headroom


def batch_cheb_conv(x, lap_dense, weight, bias=None, *,
                    compute_dtype=jnp.bfloat16):
    """x: (B, N, Cin); lap_dense: (N, N); weight: (K, Cin, Cout); bias: (Cout,)."""
    B, N, Cin = x.shape
    K, _, Cout = weight.shape
    if bias is None:
        bias = jnp.zeros((Cout,), jnp.float32)

    TB = _pick_batch_block(B, Cin, Cout, K)
    assert B % TB == 0
    n_chunks = B // TB
    width = TB * Cin
    out_width = TB * Cout

    # Layout transpose in the wrapper (not in-kernel): (B, N, Cin) -> (N, B*Cin),
    # lane order (b, c).  Cast to compute dtype so the x DMA is bf16.
    x2d = jnp.transpose(x, (1, 0, 2)).reshape(N, B * Cin).astype(compute_dtype)

    lap_c = lap_dense.astype(compute_dtype)

    # Block-diagonal fused weight:
    #   w_fused[k*TB*Cin + b*Cin + c, b*Cout + o] = weight[k, c, o]
    # so a single (N, K*TB*Cin) @ (K*TB*Cin, TB*Cout) matmul applies all K
    # Chebyshev orders to all TB packed batch elements.
    eye_tb = jnp.eye(TB, dtype=weight.dtype)
    w_fused = jnp.einsum("kco,bd->kbcdo", weight, eye_tb)
    w_fused = w_fused.reshape(K * width, out_width).astype(compute_dtype)

    bias2d = jnp.tile(bias.astype(jnp.float32), TB).reshape(1, out_width)

    kernel = functools.partial(_cheb_kernel, K=K, width=width)

    def _run(single_buffer_invariants):
        def inv_spec(shape):
            idx = lambda b: (0,) * len(shape)
            if single_buffer_invariants:
                return pl.BlockSpec(shape, idx, pipeline_mode=pl.Buffered(1))
            return pl.BlockSpec(shape, idx)

        return pl.pallas_call(
            kernel,
            out_shape=jax.ShapeDtypeStruct((N, B * Cout), x.dtype),
            grid_spec=pltpu.PrefetchScalarGridSpec(
                num_scalar_prefetch=0,
                grid=(n_chunks,),
                in_specs=[
                    pl.BlockSpec((N, width), lambda b: (0, b)),
                    # Grid-invariant operands: fetched once, single-buffered.
                    inv_spec((N, N)),
                    inv_spec((K * width, out_width)),
                    inv_spec((1, out_width)),
                ],
                out_specs=pl.BlockSpec((N, out_width), lambda b: (0, b)),
                scratch_shapes=[pltpu.VMEM((N, K * width), compute_dtype)],
            ),
            compiler_params=pltpu.CompilerParams(
                dimension_semantics=("parallel",),
                vmem_limit_bytes=_vmem_limit_bytes(),
            ),
        )(x2d, lap_c, w_fused, bias2d)

    try:
        out2d = _run(True)
    except Exception:
        # Fallback if this JAX build rejects Buffered(1) pipeline_mode.
        out2d = _run(False)

    # (N, B*Cout) -> (B, N, Cout)
    return out2d.reshape(N, B, Cout).transpose(1, 0, 2)


def build_normalized_laplacian(edge_index, num_nodes, edge_weight=None):
    """Replicates the module's __init__ Laplacian construction, densified.

    edge_index: (2, E) int32, assumed bidirectional; self-loops removed.
    Returns dense (N, N) matrix with entries -deg[row]^-0.5 * w * deg[col]^-0.5
    (duplicate edges sum, matching sparse spmm semantics).
    """
    # TODO(synk): spmm over (edge_index, lap) is densified to an (N, N) matmul;
    # a blocked/masked sparse variant is needed for very large graphs.
    row, col = edge_index[0], edge_index[1]
    keep = row != col
    row, col = row[keep], col[keep]
    if edge_weight is None:
        edge_weight = jnp.ones(row.shape[0], dtype=jnp.float32)
    else:
        edge_weight = edge_weight[keep].reshape(-1)

    deg = jnp.zeros((num_nodes,), jnp.float32).at[row].add(edge_weight)
    deg_inv_sqrt = jnp.power(deg, -0.5)
    deg_inv_sqrt = jnp.where(jnp.isinf(deg_inv_sqrt), 0.0, deg_inv_sqrt)
    lap_vals = -deg_inv_sqrt[row] * edge_weight * deg_inv_sqrt[col]

    lap_dense = jnp.zeros((num_nodes, num_nodes), jnp.float32)
    lap_dense = lap_dense.at[row, col].add(lap_vals)
    return lap_dense


def reference_forward(x, lap_dense, weight, bias):
    """Pure-JAX f32 reference mirroring the PyTorch forward."""
    K = weight.shape[0]
    tx0 = x
    out = jnp.einsum("bnc,co->bno", tx0, weight[0])
    tx1 = tx0
    if K > 1:
        tx1 = jnp.einsum("nm,bmc->bnc", lap_dense, tx0)
        out = out + jnp.einsum("bnc,co->bno", tx1, weight[1])
    for k in range(2, K):
        tx2 = 2.0 * jnp.einsum("nm,bmc->bnc", lap_dense, tx1) - tx0
        out = out + jnp.einsum("bnc,co->bno", tx2, weight[k])
        tx0, tx1 = tx1, tx2
    return out + bias


if __name__ == "__main__":
    # Small deterministic configuration.
    B, N, C_in, C_out, K = 2, 16, 4, 8, 3

    key = jax.random.PRNGKey(0)
    kx, kw, kb = jax.random.split(key, 3)

    # Ring graph on N nodes, bidirectional edges (no self loops).
    src = jnp.arange(N, dtype=jnp.int32)
    dst = (src + 1) % N
    edge_index = jnp.stack(
        [jnp.concatenate([src, dst]), jnp.concatenate([dst, src])], axis=0)

    lap_dense = build_normalized_laplacian(edge_index, N)

    # Parameter init matching torch_geometric's uniform(size, tensor):
    # bound = 1/sqrt(in_channels * K), U(-bound, bound).
    bound = 1.0 / jnp.sqrt(jnp.float32(C_in * K))
    weight = jax.random.uniform(kw, (K, C_in, C_out), jnp.float32,
                                minval=-bound, maxval=bound)
    bias = jax.random.uniform(kb, (C_out,), jnp.float32,
                              minval=-bound, maxval=bound)

    x = jax.random.normal(kx, (B, N, C_in), jnp.float32)

    out = batch_cheb_conv(x, lap_dense, weight, bias)
    out = jax.block_until_ready(out)

    ref = reference_forward(x, lap_dense, weight, bias)
    assert out.shape == (B, N, C_out)
    # bf16 MXU inputs / bf16 state slab (f32 accumulation) -> widened tolerance
    # vs the f32 reference.
    assert jnp.allclose(out, ref, atol=5e-2, rtol=5e-2)

    print("KERNEL_OK")
</pallas_src>

<mosaic_0001>
module attributes {stable_mosaic.version = 11 : i64} {
  func.func @_cheb_kernel(%arg0: i32, %arg1: memref<16x8xbf16, #tpu.memory_space<vmem>>, %arg2: memref<16x16xbf16, #tpu.memory_space<vmem>>, %arg3: memref<24x16xbf16, #tpu.memory_space<vmem>>, %arg4: memref<1x16xf32, #tpu.memory_space<vmem>>, %arg5: memref<16x16xf32, #tpu.memory_space<vmem>>, %arg6: memref<16x24xbf16, #tpu.memory_space<vmem>>) attributes {dimension_semantics = [#tpu.dimension_semantics<parallel>], iteration_bounds = array<i64: 1>, scalar_prefetch = 0 : i64, scratch_operands = 1 : i64, tpu.core_type = #tpu.core_type<tc>, window_params = [{transform_indices = @transform_0, window_bounds = array<i64: 16, 8>}, {pipeline_mode = #tpu.pipeline_mode<synchronous>, transform_indices = @transform_1, window_bounds = array<i64: 16, 16>}, {pipeline_mode = #tpu.pipeline_mode<synchronous>, transform_indices = @transform_2, window_bounds = array<i64: 24, 16>}, {pipeline_mode = #tpu.pipeline_mode<synchronous>, transform_indices = @transform_3, window_bounds = array<i64: 1, 16>}, {transform_indices = @transform_4, window_bounds = array<i64: 16, 16>}]} {
    %c0 = arith.constant 0 : index
    %c0_0 = arith.constant 0 : index
    %0 = vector.load %arg2[%c0, %c0_0] : memref<16x16xbf16, #tpu.memory_space<vmem>>, vector<16x16xbf16>
    %c0_1 = arith.constant 0 : index
    %c0_2 = arith.constant 0 : index
    %1 = vector.load %arg1[%c0_1, %c0_2] : memref<16x8xbf16, #tpu.memory_space<vmem>>, vector<16x8xbf16>
    %c0_3 = arith.constant 0 : index
    %c0_4 = arith.constant 0 : index
    %2 = vector.load %arg6[%c0_3, %c0_4] : memref<16x24xbf16, #tpu.memory_space<vmem>>, vector<16x8xbf16>
    tpu.vector_store %arg6[%c0_3, %c0_4], %1 {strides = array<i32>} : memref<16x24xbf16, #tpu.memory_space<vmem>>, vector<16x8xbf16>,
    %c0_5 = arith.constant 0 : index
    %c0_6 = arith.constant 0 : index
    %3 = vector.load %arg6[%c0_5, %c0_6] : memref<16x24xbf16, #tpu.memory_space<vmem>>, vector<16x8xbf16>
    %cst = arith.constant dense<0.000000e+00> : vector<16x8xf32>
    %4 = tpu.matmul %0, %3, %cst {dimension_numbers = #tpu.dot_dimension_numbers<[1], [0], [0], [1], [0, 0, 1, 1], [], []>} : vector<16x16xbf16>, vector<16x8xbf16>, vector<16x8xf32> -> vector<16x8xf32>
    %5 = arith.truncf %4 : vector<16x8xf32> to vector<16x8xbf16>
    %c0_7 = arith.constant 0 : index
    %c8 = arith.constant 8 : index
    %6 = vector.load %arg6[%c0_7, %c8] : memref<16x24xbf16, #tpu.memory_space<vmem>>, vector<16x8xbf16>
    tpu.vector_store %arg6[%c0_7, %c8], %5 {strides = array<i32>} : memref<16x24xbf16, #tpu.memory_space<vmem>>, vector<16x8xbf16>,
    %c0_8 = arith.constant 0 : index
    %c8_9 = arith.constant 8 : index
    %7 = vector.load %arg6[%c0_8, %c8_9] : memref<16x24xbf16, #tpu.memory_space<vmem>>, vector<16x8xbf16>
    %c0_10 = arith.constant 0 : index
    %c0_11 = arith.constant 0 : index
    %8 = vector.load %arg6[%c0_10, %c0_11] : memref<16x24xbf16, #tpu.memory_space<vmem>>, vector<16x8xbf16>
    %cst_12 = arith.constant dense<0.000000e+00> : vector<16x8xf32>
    %9 = tpu.matmul %0, %7, %cst_12 {dimension_numbers = #tpu.dot_dimension_numbers<[1], [0], [0], [1], [0, 0, 1, 1], [], []>} : vector<16x16xbf16>, vector<16x8xbf16>, vector<16x8xf32> -> vector<16x8xf32>
    %cst_13 = arith.constant 2.000000e+00 : f32
    %10 = vector.broadcast %cst_13 : f32 to vector<16x8xf32>
    %11 = arith.mulf %10, %9 : vector<16x8xf32>
    %12 = arith.extf %8 : vector<16x8xbf16> to vector<16x8xf32>
    %13 = arith.subf %11, %12 : vector<16x8xf32>
    %14 = arith.truncf %13 : vector<16x8xf32> to vector<16x8xbf16>
    %c0_14 = arith.constant 0 : index
    %c16 = arith.constant 16 : index
    %15 = vector.load %arg6[%c0_14, %c16] : memref<16x24xbf16, #tpu.memory_space<vmem>>, vector<16x8xbf16>
    tpu.vector_store %arg6[%c0_14, %c16], %14 {strides = array<i32>} : memref<16x24xbf16, #tpu.memory_space<vmem>>, vector<16x8xbf16>,
    %c0_15 = arith.constant 0 : index
    %c0_16 = arith.constant 0 : index
    %16 = vector.load %arg6[%c0_15, %c0_16] : memref<16x24xbf16, #tpu.memory_space<vmem>>, vector<16x24xbf16>
    %c0_17 = arith.constant 0 : index
    %c0_18 = arith.constant 0 : index
    %17 = vector.load %arg3[%c0_17, %c0_18] : memref<24x16xbf16, #tpu.memory_space<vmem>>, vector<24x16xbf16>
    %cst_19 = arith.constant dense<0.000000e+00> : vector<16x16xf32>
    %18 = tpu.matmul %16, %17, %cst_19 {dimension_numbers = #tpu.dot_dimension_numbers<[1], [0], [0], [1], [0, 0, 1, 1], [], []>} : vector<16x24xbf16>, vector<24x16xbf16>, vector<16x16xf32> -> vector<16x16xf32>
    %c0_20 = arith.constant 0 : index
    %c0_21 = arith.constant 0 : index
    %19 = vector.load %arg4[%c0_20, %c0_21] : memref<1x16xf32, #tpu.memory_space<vmem>>, vector<1x16xf32>
    %20 = vector.broadcast %19 : vector<1x16xf32> to vector<16x16xf32>
    %21 = arith.addf %18, %20 : vector<16x16xf32>
    %c0_22 = arith.constant 0 : index
    %c0_23 = arith.constant 0 : index
    %22 = vector.load %arg5[%c0_22, %c0_23] : memref<16x16xf32, #tpu.memory_space<vmem>>, vector<16x16xf32>
    tpu.vector_store %arg5[%c0_22, %c0_23], %21 {strides = array<i32>} : memref<16x16xf32, #tpu.memory_space<vmem>>, vector<16x16xf32>,
    return
  }
  func.func @transform_0(%arg0: i32) -> (i32, i32) {
    %c0_i32 = arith.constant 0 : i32
    %c0_i32_0 = arith.constant 0 : i32
    return %c0_i32, %arg0 : i32, i32
  }
  func.func @transform_1(%arg0: i32) -> (i32, i32) {
    %c0_i32 = arith.constant 0 : i32
    %c0_i32_0 = arith.constant 0 : i32
    %c0_i32_1 = arith.constant 0 : i32
    return %c0_i32, %c0_i32_0 : i32, i32
  }
  func.func @transform_2(%arg0: i32) -> (i32, i32) {
    %c0_i32 = arith.constant 0 : i32
    %c0_i32_0 = arith.constant 0 : i32
    %c0_i32_1 = arith.constant 0 : i32
    return %c0_i32, %c0_i32_0 : i32, i32
  }
  func.func @transform_3(%arg0: i32) -> (i32, i32) {
    %c0_i32 = arith.constant 0 : i32
    %c0_i32_0 = arith.constant 0 : i32
    %c0_i32_1 = arith.constant 0 : i32
    return %c0_i32, %c0_i32_0 : i32, i32
  }
  func.func @transform_4(%arg0: i32) -> (i32, i32) {
    %c0_i32 = arith.constant 0 : i32
    %c0_i32_0 = arith.constant 0 : i32
    return %c0_i32, %arg0 : i32, i32
  }
}

module attributes {stable_mosaic.version = 11 : i64} {
  func.func @_cheb_kernel(%arg0: i32, %arg1: memref<16x8xbf16, #tpu.memory_space<vmem>>, %arg2: memref<16x16xbf16, #tpu.memory_space<vmem>>, %arg3: memref<24x16xbf16, #tpu.memory_space<vmem>>, %arg4: memref<1x16xf32, #tpu.memory_space<vmem>>, %arg5: memref<16x16xf32, #tpu.memory_space<vmem>>, %arg6: memref<16x24xbf16, #tpu.memory_space<vmem>>) attributes {dimension_semantics = [#tpu.dimension_semantics<parallel>], iteration_bounds = array<i64: 1>, scalar_prefetch = 0 : i64, scratch_operands = 1 : i64, tpu.core_type = #tpu.core_type<tc>, window_params = [{transform_indices = @transform_0, window_bounds = array<i64: 16, 8>}, {pipeline_mode = #tpu.pipeline_mode<synchronous>, transform_indices = @transform_1, window_bounds = array<i64: 16, 16>}, {pipeline_mode = #tpu.pipeline_mode<synchronous>, transform_indices = @transform_2, window_bounds = array<i64: 24, 16>}, {pipeline_mode = #tpu.pipeline_mode<synchronous>, transform_indices = @transform_3, window_bounds = array<i64: 1, 16>}, {transform_indices = @transform_4, window_bounds = array<i64: 16, 16>}]} {
    %c0 = arith.constant 0 : index
    %c0_0 = arith.constant 0 : index
    %0 = vector.load %arg2[%c0, %c0_0] : memref<16x16xbf16, #tpu.memory_space<vmem>>, vector<16x16xbf16>
    %c0_1 = arith.constant 0 : index
    %c0_2 = arith.constant 0 : index
    %1 = vector.load %arg1[%c0_1, %c0_2] : memref<16x8xbf16, #tpu.memory_space<vmem>>, vector<16x8xbf16>
    %c0_3 = arith.constant 0 : index
    %c0_4 = arith.constant 0 : index
    %2 = vector.load %arg6[%c0_3, %c0_4] : memref<16x24xbf16, #tpu.memory_space<vmem>>, vector<16x8xbf16>
    tpu.vector_store %arg6[%c0_3, %c0_4], %1 {strides = array<i32>} : memref<16x24xbf16, #tpu.memory_space<vmem>>, vector<16x8xbf16>,
    %c0_5 = arith.constant 0 : index
    %c0_6 = arith.constant 0 : index
    %3 = vector.load %arg6[%c0_5, %c0_6] : memref<16x24xbf16, #tpu.memory_space<vmem>>, vector<16x8xbf16>
    %cst = arith.constant dense<0.000000e+00> : vector<16x8xf32>
    %4 = tpu.matmul %0, %3, %cst {dimension_numbers = #tpu.dot_dimension_numbers<[1], [0], [0], [1], [0, 0, 1, 1], [], []>} : vector<16x16xbf16>, vector<16x8xbf16>, vector<16x8xf32> -> vector<16x8xf32>
    %5 = arith.truncf %4 : vector<16x8xf32> to vector<16x8xbf16>
    %c0_7 = arith.constant 0 : index
    %c8 = arith.constant 8 : index
    %6 = vector.load %arg6[%c0_7, %c8] : memref<16x24xbf16, #tpu.memory_space<vmem>>, vector<16x8xbf16>
    tpu.vector_store %arg6[%c0_7, %c8], %5 {strides = array<i32>} : memref<16x24xbf16, #tpu.memory_space<vmem>>, vector<16x8xbf16>,
    %c0_8 = arith.constant 0 : index
    %c8_9 = arith.constant 8 : index
    %7 = vector.load %arg6[%c0_8, %c8_9] : memref<16x24xbf16, #tpu.memory_space<vmem>>, vector<16x8xbf16>
    %c0_10 = arith.constant 0 : index
    %c0_11 = arith.constant 0 : index
    %8 = vector.load %arg6[%c0_10, %c0_11] : memref<16x24xbf16, #tpu.memory_space<vmem>>, vector<16x8xbf16>
    %cst_12 = arith.constant dense<0.000000e+00> : vector<16x8xf32>
    %9 = tpu.matmul %0, %7, %cst_12 {dimension_numbers = #tpu.dot_dimension_numbers<[1], [0], [0], [1], [0, 0, 1, 1], [], []>} : vector<16x16xbf16>, vector<16x8xbf16>, vector<16x8xf32> -> vector<16x8xf32>
    %cst_13 = arith.constant 2.000000e+00 : f32
    %10 = vector.broadcast %cst_13 : f32 to vector<16x8xf32>
    %11 = arith.mulf %10, %9 : vector<16x8xf32>
    %12 = arith.extf %8 : vector<16x8xbf16> to vector<16x8xf32>
    %13 = arith.subf %11, %12 : vector<16x8xf32>
    %14 = arith.truncf %13 : vector<16x8xf32> to vector<16x8xbf16>
    %c0_14 = arith.constant 0 : index
    %c16 = arith.constant 16 : index
    %15 = vector.load %arg6[%c0_14, %c16] : memref<16x24xbf16, #tpu.memory_space<vmem>>, vector<16x8xbf16>
    tpu.vector_store %arg6[%c0_14, %c16], %14 {strides = array<i32>} : memref<16x24xbf16, #tpu.memory_space<vmem>>, vector<16x8xbf16>,
    %c0_15 = arith.constant 0 : index
    %c0_16 = arith.constant 0 : index
    %16 = vector.load %arg6[%c0_15, %c0_16] : memref<16x24xbf16, #tpu.memory_space<vmem>>, vector<16x24xbf16>
    %c0_17 = arith.constant 0 : index
    %c0_18 = arith.constant 0 : index
    %17 = vector.load %arg3[%c0_17, %c0_18] : memref<24x16xbf16, #tpu.memory_space<vmem>>, vector<24x16xbf16>
    %cst_19 = arith.constant dense<0.000000e+00> : vector<16x16xf32>
    %18 = tpu.matmul %16, %17, %cst_19 {dimension_numbers = #tpu.dot_dimension_numbers<[1], [0], [0], [1], [0, 0, 1, 1], [], []>} : vector<16x24xbf16>, vector<24x16xbf16>, vector<16x16xf32> -> vector<16x16xf32>
    %c0_20 = arith.constant 0 : index
    %c0_21 = arith.constant 0 : index
    %19 = vector.load %arg4[%c0_20, %c0_21] : memref<1x16xf32, #tpu.memory_space<vmem>>, vector<1x16xf32>
    %20 = vector.broadcast %19 : vector<1x16xf32> to vector<16x16xf32>
    %21 = arith.addf %18, %20 : vector<16x16xf32>
    %c0_22 = arith.constant 0 : index
    %c0_23 = arith.constant 0 : index
    %22 = vector.load %arg5[%c0_22, %c0_23] : memref<16x16xf32, #tpu.memory_space<vmem>>, vector<16x16xf32>
    tpu.vector_store %arg5[%c0_22, %c0_23], %21 {strides = array<i32>} : memref<16x16xf32, #tpu.memory_space<vmem>>, vector<16x16xf32>,
    return
  }
  func.func @transform_0(%arg0: i32) -> (i32, i32) {
    %c0_i32 = arith.constant 0 : i32
    %c0_i32_0 = arith.constant 0 : i32
    return %c0_i32, %arg0 : i32, i32
  }
  func.func @transform_1(%arg0: i32) -> (i32, i32) {
    %c0_i32 = arith.constant 0 : i32
    %c0_i32_0 = arith.constant 0 : i32
    %c0_i32_1 = arith.constant 0 : i32
    return %c0_i32, %c0_i32_0 : i32, i32
  }
  func.func @transform_2(%arg0: i32) -> (i32, i32) {
    %c0_i32 = arith.constant 0 : i32
    %c0_i32_0 = arith.constant 0 : i32
    %c0_i32_1 = arith.constant 0 : i32
    return %c0_i32, %c0_i32_0 : i32, i32
  }
  func.func @transform_3(%arg0: i32) -> (i32, i32) {
    %c0_i32 = arith.constant 0 : i32
    %c0_i32_0 = arith.constant 0 : i32
    %c0_i32_1 = arith.constant 0 : i32
    return %c0_i32, %c0_i32_0 : i32, i32
  }
  func.func @transform_4(%arg0: i32) -> (i32, i32) {
    %c0_i32 = arith.constant 0 : i32
    %c0_i32_0 = arith.constant 0 : i32
    return %c0_i32, %arg0 : i32, i32
  }
}

</mosaic_0001>

<bundles_post_ra>
// kernel: tpu_custom_call.1
= control target key start
LH: loop header
LB: loop body
LE: loop exit
PB: predicated region body
PF: predicated region fallthrough
CT: control target
= control target key end

     0   :  { %v305_v1 = vmov 0.0   ;;  %vm29_vm0 = vcmask 64512   ;;  %vm306_vm1 = vmmov 0   ;;  %s370_s0 = inlined_call_operand.vmem [shape: bf16[16,8], index: 0, kind: input, shape index: {}]   ;;  %s371_s1 = inlined_call_operand.vmem [shape: bf16[16,16], index: 1, kind: input, shape index: {}]   ;;  %s372_s2 = inlined_call_operand.vmem [shape: bf16[24,16], index: 2, kind: input, shape index: {}]   ;;  %s373_s3 = inlined_call_operand.vmem [shape: f32[1,16], index: 3, kind: input, shape index: {}]   ;;  %s374_s4 = inlined_call_operand.hbm [shape: f32[16,16], index: 4, kind: output, shape index: {}]  }
   0x1   :  { %v277_v0 = vld [vmem:[%s370_s0] sm:$0xff]   ;;  %250 = vmatprep.subr.bf16.mxu0 %v305_v1  ;;  %256 = vmatprep.subr.bf16.mxu1 %v305_v1 }
   0x2   :  { %30 = vst.msk [vmem:[#allocation2] sm:$0xff] %vm29_vm0, %v277_v0  ;;  %252 = vmatprep.mubr.msk.bf16.mxu0 %vm306_vm1, %v305_v1  ;;  %258 = vmatprep.mubr.msk.bf16.mxu1 %vm306_vm1, %v305_v1 }
   0x3   :  { %9 = vsyncpa [#allocation4], 0  ;;  %v278_v3 = vld [vmem:[%s371_s1] sm:$0xff]   ;;  %vm37_vm2 = vcmask 130048   ;;  %s307_s0 = smov 8   ;;  %vm87_vm3 = vcmask 130112  }
   0x4   :  { %s308_s19 = smov 120   ;;  %v279_v12 = vld [vmem:[%s372_s2] sm:$0xff]   ;;  %v280_v13 = vld [vmem:[%s372_s2 + $0x8] ss:$0 sps:$4 sm:$0xff]   ;;  %vm172_vm4 = vcmask 1043456   ;;  %s309_s23 = smov 16  }
   0x5   :  { %v174_v14 = vsel %vm172_vm4, %v280_v13, 0  ;;  %vm146_vm5 = vcmask 195712   ;;  %vm168_vm6 = vcmask 195584   ;;  %v239_v28 = vld [vmem:[%s373_s3] ss:$0 sm:$0xff]  ;;  %s310_s25 = smov [#allocation3]  }
   0x6   :  { %s224_s26 = sshll.u32 %s310_s25, 4  ;;  %s225_s26 = int_to_ptr.vmem [resolvable:$true] %s224_s26 }
   0x7   :  { %s281_s27 = scalar_lea.vmem %s225_s26, 256  ;;  %p286_p1 = scmp.lt.s32.totalorder %s225_s26, %s225_s26 }
   0x8   :  { %p282_p0 = scmp.ne.s32.totalorder %s225_s26, %s281_s27  ;;  %p287_p2 = scmp.lt.s32.totalorder %s281_s27, %s281_s27 }
   0x9   :  { %v31_v2 = vld [vmem:[#allocation2] sm:$0xff] }
   0xa   :  { %251 = vmatpush3.bf16.msra.mxu0 %v31_v2  ;;  %p288_p3 = por %p287_p2, %p286_p1 }
   0xb   :  { %262 = vmatprep.subr.bf16.mxu0 %v305_v1 }
   0xc   :  { %p289_p4 = pnand %p288_p3, %p282_p0 }
   0xd   :  { %253 = vmatmul.mubr.msk.bf16.vlgmr.msra.gmra.mrb[0].mxu0 %vm37_vm2, %v278_v3 }
   0xe   :  { %266 = vmatprep.mubr.msk.bf16.mxu0 %vm306_vm1, %v305_v1  ;;  %263 = vmatpush3.bf16.msra.mxu0 %v279_v12 }
   0xf   :  { %264 = vmatprep.subr.bf16.mxu0 %v305_v1 }
  0x12   :  { %265 = vmatpush3.bf16.msra.mxu0 %v174_v14 }
  0xe0   :  { %v75_v4 = vpop.f32.mrb[0].mxu0 }
  0xe1   :  { %v254_v5 = vpop.f32.mrb[1].mxu0 }
  0xe2   :  { %v78_v6 = vpop.f32.mrb[2].mxu0 }
  0xe3   :  { %v82_v7 = vpack.c.bf16 %v78_v6, %v75_v4  ;;  %v255_v8 = vpop.f32.mrb[3].mxu0 }
  0xe5   :  { %84 = vrot.lane.b32.xlu0 %v82_v7, %s307_s0 }
 0x157   :  { %v85_v9 = vpop.permute.xlu0 %84 }
 0x158   :  { %88 = vst.msk [vmem:[#allocation2] sm:$0xff] %vm87_vm3, %v85_v9 }
 0x15f   :  { %v89_v10 = vld [vmem:[#allocation2] sm:$0xff] }
 0x160   :  { %91 = vrot.lane.b32.xlu0 %v89_v10, %s308_s19  ;;  %v137_v19 = vunpack.c.l.bf16 %v89_v10  ;;  %v138_v21 = vunpack.c.h.bf16 %v89_v10 }
 0x1d2   :  { %v92_v11 = vpop.permute.xlu0 %91 }
 0x1d3   :  { %257 = vmatpush3.bf16.msra.mxu1 %v92_v11 }
 0x1d6   :  { %259 = vmatmul.mubr.msk.bf16.vlgmr.msra.gmra.mrb[0].mxu1 %vm37_vm2, %v278_v3 }
 0x2a9   :  { %v128_v15 = vpop.f32.mrb[0].mxu1 }
 0x2aa   :  { %v135_v16 = vmul.f32 2.0, %v128_v15  ;;  %v260_v17 = vpop.f32.mrb[1].mxu1 }
 0x2ab   :  { %v131_v18 = vpop.f32.mrb[2].mxu1 }
 0x2ac   :  { %v136_v20 = vmul.f32 2.0, %v131_v18  ;;  %v261_v22 = vpop.f32.mrb[3].mxu1  ;;  %v139_v23 = vsub.f32 %v135_v16, %v137_v19 }
 0x2ae   :  { %v140_v24 = vsub.f32 %v136_v20, %v138_v21 }
 0x2b0   :  { %v141_v25 = vpack.c.bf16 %v140_v24, %v139_v23 }
 0x2b2   :  { %143 = vrot.lane.b32.xlu1 %v141_v25, %s309_s23 }
 0x324   :  { %v144_v26 = vpop.permute.xlu1 %143 }
 0x325   :  { %147 = vst.msk [vmem:[#allocation2] sm:$0xff] %vm146_vm5, %v144_v26 }
 0x32c   :  { %v148_v27 = vld [vmem:[#allocation2] sm:$0xff] }
 0x32d   :  { %267 = vmatmul.mubr.msk.bf16.vlgmr.msra.gmra.mrb[4].mxu0 %vm168_vm6, %v148_v27 }
 0x400   :  { %v210_v29 = vpop.f32.mrb[4].mxu0 }
 0x401   :  { %v211_v30 = vadd.f32 %v239_v28, %v210_v29  ;;  %v268_v31 = vpop.f32.mrb[5].mxu0 }
 0x402   :  { %v213_v32 = vpop.f32.mrb[6].mxu0 }
 0x403   :  { %217 = vst.msk [vmem:[#allocation3] sm:$0xff] %vm37_vm2, %v211_v30  ;;  %v214_v33 = vadd.f32 %v239_v28, %v213_v32  ;;  %v269_v34 = vpop.f32.mrb[7].mxu0 }
 0x405   :  { %218 = vst.msk [vmem:[#allocation3 + $0x8] sm:$0xff] %vm37_vm2, %v214_v33 }
 0x406   :  { %292 = shalt.err (!%p289_p4)
}
 0x407   :  { %s293_s29 = scalar_lea.hbm %s374_s4, 256 }
 0x408   :  { %p294_p5 = scmp.ne.s32.totalorder %s374_s4, %s293_s29  ;;  %p297_p6 = scmp.lt.u32.totalorder %s293_s29, %s374_s4 }
 0x40a   :  { %p299_p7 = pnand %p297_p6, %p294_p5 }
 0x40c   :  { %302 = shalt.err (!%p299_p7)
}
 0x40d   :  { %s311_s8 = smov 128  }
 0x40e   :  { %230 = dma.vmem_to_hbm [thread:$0]  %s225_s26, 256, %s374_s4, [#allocation4], %s311_s8, %s311_s8, %s307_s0  }
 0x40f   :  { %303 = dma.done.wait [#allocation4], 256  }
 0x410   :  { %304 = vsyncadd [#allocation4], 4294967040 }
 0x411   :  { %234 = vsyncpa [#allocation4], 1 }

// kernel: tpu_custom_call.1
= control target key start
LH: loop header
LB: loop body
LE: loop exit
PB: predicated region body
PF: predicated region fallthrough
CT: control target
= control target key end

     0   :  { %v305_v1 = vmov 0.0   ;;  %vm29_vm0 = vcmask 64512   ;;  %vm306_vm1 = vmmov 0   ;;  %s370_s0 = inlined_call_operand.vmem [shape: bf16[16,8], index: 0, kind: input, shape index: {}]   ;;  %s371_s1 = inlined_call_operand.vmem [shape: bf16[16,16], index: 1, kind: input, shape index: {}]   ;;  %s372_s2 = inlined_call_operand.vmem [shape: bf16[24,16], index: 2, kind: input, shape index: {}]   ;;  %s373_s3 = inlined_call_operand.vmem [shape: f32[1,16], index: 3, kind: input, shape index: {}]   ;;  %s374_s4 = inlined_call_operand.hbm [shape: f32[16,16], index: 4, kind: output, shape index: {}]  }
   0x1   :  { %v277_v0 = vld [vmem:[%s370_s0] sm:$0xff]   ;;  %250 = vmatprep.subr.bf16.mxu0 %v305_v1  ;;  %256 = vmatprep.subr.bf16.mxu1 %v305_v1 }
   0x2   :  { %30 = vst.msk [vmem:[#allocation2] sm:$0xff] %vm29_vm0, %v277_v0  ;;  %252 = vmatprep.mubr.msk.bf16.mxu0 %vm306_vm1, %v305_v1  ;;  %258 = vmatprep.mubr.msk.bf16.mxu1 %vm306_vm1, %v305_v1 }
   0x3   :  { %9 = vsyncpa [#allocation4], 0  ;;  %v278_v3 = vld [vmem:[%s371_s1] sm:$0xff]   ;;  %vm37_vm2 = vcmask 130048   ;;  %s307_s0 = smov 8   ;;  %vm87_vm3 = vcmask 130112  }
   0x4   :  { %s308_s19 = smov 120   ;;  %v279_v12 = vld [vmem:[%s372_s2] sm:$0xff]   ;;  %v280_v13 = vld [vmem:[%s372_s2 + $0x8] ss:$0 sps:$4 sm:$0xff]   ;;  %vm172_vm4 = vcmask 1043456   ;;  %s309_s23 = smov 16  }
   0x5   :  { %v174_v14 = vsel %vm172_vm4, %v280_v13, 0  ;;  %vm146_vm5 = vcmask 195712   ;;  %vm168_vm6 = vcmask 195584   ;;  %v239_v28 = vld [vmem:[%s373_s3] ss:$0 sm:$0xff]  ;;  %s310_s25 = smov [#allocation3]  }
   0x6   :  { %s224_s26 = sshll.u32 %s310_s25, 4  ;;  %s225_s26 = int_to_ptr.vmem [resolvable:$true] %s224_s26 }
   0x7   :  { %s281_s27 = scalar_lea.vmem %s225_s26, 256  ;;  %p286_p1 = scmp.lt.s32.totalorder %s225_s26, %s225_s26 }
   0x8   :  { %p282_p0 = scmp.ne.s32.totalorder %s225_s26, %s281_s27  ;;  %p287_p2 = scmp.lt.s32.totalorder %s281_s27, %s281_s27 }
   0x9   :  { %v31_v2 = vld [vmem:[#allocation2] sm:$0xff] }
   0xa   :  { %251 = vmatpush3.bf16.msra.mxu0 %v31_v2  ;;  %p288_p3 = por %p287_p2, %p286_p1 }
   0xb   :  { %262 = vmatprep.subr.bf16.mxu0 %v305_v1 }
   0xc   :  { %p289_p4 = pnand %p288_p3, %p282_p0 }
   0xd   :  { %253 = vmatmul.mubr.msk.bf16.vlgmr.msra.gmra.mrb[0].mxu0 %vm37_vm2, %v278_v3 }
   0xe   :  { %266 = vmatprep.mubr.msk.bf16.mxu0 %vm306_vm1, %v305_v1  ;;  %263 = vmatpush3.bf16.msra.mxu0 %v279_v12 }
   0xf   :  { %264 = vmatprep.subr.bf16.mxu0 %v305_v1 }
  0x12   :  { %265 = vmatpush3.bf16.msra.mxu0 %v174_v14 }
  0xe0   :  { %v75_v4 = vpop.f32.mrb[0].mxu0 }
  0xe1   :  { %v254_v5 = vpop.f32.mrb[1].mxu0 }
  0xe2   :  { %v78_v6 = vpop.f32.mrb[2].mxu0 }
  0xe3   :  { %v82_v7 = vpack.c.bf16 %v78_v6, %v75_v4  ;;  %v255_v8 = vpop.f32.mrb[3].mxu0 }
  0xe5   :  { %84 = vrot.lane.b32.xlu0 %v82_v7, %s307_s0 }
 0x157   :  { %v85_v9 = vpop.permute.xlu0 %84 }
 0x158   :  { %88 = vst.msk [vmem:[#allocation2] sm:$0xff] %vm87_vm3, %v85_v9 }
 0x15f   :  { %v89_v10 = vld [vmem:[#allocation2] sm:$0xff] }
 0x160   :  { %91 = vrot.lane.b32.xlu0 %v89_v10, %s308_s19  ;;  %v137_v19 = vunpack.c.l.bf16 %v89_v10  ;;  %v138_v21 = vunpack.c.h.bf16 %v89_v10 }
 0x1d2   :  { %v92_v11 = vpop.permute.xlu0 %91 }
 0x1d3   :  { %257 = vmatpush3.bf16.msra.mxu1 %v92_v11 }
 0x1d6   :  { %259 = vmatmul.mubr.msk.bf16.vlgmr.msra.gmra.mrb[0].mxu1 %vm37_vm2, %v278_v3 }
 0x2a9   :  { %v128_v15 = vpop.f32.mrb[0].mxu1 }
 0x2aa   :  { %v135_v16 = vmul.f32 2.0, %v128_v15  ;;  %v260_v17 = vpop.f32.mrb[1].mxu1 }
 0x2ab   :  { %v131_v18 = vpop.f32.mrb[2].mxu1 }
 0x2ac   :  { %v136_v20 = vmul.f32 2.0, %v131_v18  ;;  %v261_v22 = vpop.f32.mrb[3].mxu1  ;;  %v139_v23 = vsub.f32 %v135_v16, %v137_v19 }
 0x2ae   :  { %v140_v24 = vsub.f32 %v136_v20, %v138_v21 }
 0x2b0   :  { %v141_v25 = vpack.c.bf16 %v140_v24, %v139_v23 }
 0x2b2   :  { %143 = vrot.lane.b32.xlu1 %v141_v25, %s309_s23 }
 0x324   :  { %v144_v26 = vpop.permute.xlu1 %143 }
 0x325   :  { %147 = vst.msk [vmem:[#allocation2] sm:$0xff] %vm146_vm5, %v144_v26 }
 0x32c   :  { %v148_v27 = vld [vmem:[#allocation2] sm:$0xff] }
 0x32d   :  { %267 = vmatmul.mubr.msk.bf16.vlgmr.msra.gmra.mrb[4].mxu0 %vm168_vm6, %v148_v27 }
 0x400   :  { %v210_v29 = vpop.f32.mrb[4].mxu0 }
 0x401   :  { %v211_v30 = vadd.f32 %v239_v28, %v210_v29  ;;  %v268_v31 = vpop.f32.mrb[5].mxu0 }
 0x402   :  { %v213_v32 = vpop.f32.mrb[6].mxu0 }
 0x403   :  { %217 = vst.msk [vmem:[#allocation3] sm:$0xff] %vm37_vm2, %v211_v30  ;;  %v214_v33 = vadd.f32 %v239_v28, %v213_v32  ;;  %v269_v34 = vpop.f32.mrb[7].mxu0 }
 0x405   :  { %218 = vst.msk [vmem:[#allocation3 + $0x8] sm:$0xff] %vm37_vm2, %v214_v33 }
 0x406   :  { %292 = shalt.err (!%p289_p4)
}
 0x407   :  { %s293_s29 = scalar_lea.hbm %s374_s4, 256 }
 0x408   :  { %p294_p5 = scmp.ne.s32.totalorder %s374_s4, %s293_s29  ;;  %p297_p6 = scmp.lt.u32.totalorder %s293_s29, %s374_s4 }
 0x40a   :  { %p299_p7 = pnand %p297_p6, %p294_p5 }
 0x40c   :  { %302 = shalt.err (!%p299_p7)
}
 0x40d   :  { %s311_s8 = smov 128  }
 0x40e   :  { %230 = dma.vmem_to_hbm [thread:$0]  %s225_s26, 256, %s374_s4, [#allocation4], %s311_s8, %s311_s8, %s307_s0  }
 0x40f   :  { %303 = dma.done.wait [#allocation4], 256  }
 0x410   :  { %304 = vsyncadd [#allocation4], 4294967040 }
 0x411   :  { %234 = vsyncpa [#allocation4], 1 }

</bundles_post_ra>
